<compile_context>
chip_gen: v6e
topology: v6e:2x2x1
jax: 0.10.0
libtpu: 0.0.40
codegen_flags: <defaults>
</compile_context>

<pallas_src>
import jax
import jax.numpy as jnp
from jax.experimental import pallas as pl
from jax.experimental.pallas import tpu as pltpu

L_IN = 7 * 8          # longueurEntree = 56
L_OUT = 1 * 8         # longueurSortie = 8
D0 = L_IN * 7         # 392  (fc1 in)   — 49*8, sublane aligned, used as full-dim block
D1 = L_IN * 9         # 504  (fc1 out / fc2 in)
D2 = L_OUT * 20       # 160  (fc2 out / fc3 in)
D3 = L_OUT * 2        # 16   (fc3 out)  — used as full-dim block (natural width)

# Lane-aligned padded hidden dims (padded weight rows/cols and bias lanes are zero,
# so the math on the real lanes is unchanged and padded lanes stay exactly 0).
D1P = 512
D2P = 256


def _round_up(x, m):
    return (x + m - 1) // m * m


def net_kernel(a1_ref, a2_ref,                  # PReLU scalars (SMEM, full array)
               x_ref, w1_ref, b1_ref,
               w2_ref, b2_ref,
               w3_ref, b3_ref,
               o_ref):
    # bf16 MXU operands, f32 accumulate; bias add + PReLU in f32.
    x = x_ref[...].astype(jnp.bfloat16)                               # (TM, 392)

    # fc1 + PReLU1
    h1 = jnp.dot(x, w1_ref[...], preferred_element_type=jnp.float32) + b1_ref[...]
    h1 = jnp.where(h1 >= 0.0, h1, a1_ref[0] * h1)                     # (TM, 512)

    # fc2 + PReLU2
    h2 = jnp.dot(h1.astype(jnp.bfloat16), w2_ref[...],
                 preferred_element_type=jnp.float32) + b2_ref[...]
    h2 = jnp.where(h2 >= 0.0, h2, a2_ref[0] * h2)                     # (TM, 256)

    # fc3 (no activation) — natural 16-wide output
    o_ref[...] = (jnp.dot(h2.astype(jnp.bfloat16), w3_ref[...],
                          preferred_element_type=jnp.float32) + b3_ref[...])


def pad_params(params):
    """Pad hidden dims to lane-aligned sizes and store weights as bf16 (once)."""
    w1, b1, w2, b2, w3, b3, a1, a2 = params
    w1p = jnp.zeros((D0, D1P), jnp.bfloat16).at[:, :D1].set(w1.astype(jnp.bfloat16))
    b1p = jnp.zeros((1, D1P), jnp.float32).at[:, :D1].set(b1)
    w2p = jnp.zeros((D1P, D2P), jnp.bfloat16).at[:D1, :D2].set(w2.astype(jnp.bfloat16))
    b2p = jnp.zeros((1, D2P), jnp.float32).at[:, :D2].set(b2)
    w3p = jnp.zeros((D2P, D3), jnp.bfloat16).at[:D2, :].set(w3.astype(jnp.bfloat16))
    b3p = b3.astype(jnp.float32)
    return (w1p, b1p, w2p, b2p, w3p, b3p,
            a1.astype(jnp.float32), a2.astype(jnp.float32))


def _choose_tiling(B, tm):
    """Near-equal, sublane-aligned batch tiles with bounded padding waste."""
    n_tiles = max(pl.cdiv(B, tm), 1)
    # Moderate batches: make at least 2 tiles so the "parallel" batch axis can
    # shard across v7x's two TensorCores (no-op on v5e/v6e).
    if n_tiles == 1 and B >= 128:
        n_tiles = 2
    TM = _round_up(pl.cdiv(B, n_tiles), 8)
    return TM, TM * n_tiles, n_tiles


def net_forward(x, padded_params, *, tm=512):
    """x: (B, 392) float32. Returns (B, 16) float32."""
    w1, b1, w2, b2, w3, b3, a1, a2 = padded_params
    B = x.shape[0]
    TM, B_pad, n_tiles = _choose_tiling(B, tm)

    x = x.astype(jnp.float32)
    if B_pad != B:
        # Only batch rows are padded; feature dim stays at its natural 392.
        x = jnp.zeros((B_pad, D0), jnp.float32).at[:B, :].set(x)

    smem = pl.BlockSpec(memory_space=pltpu.MemorySpace.SMEM)   # whole array, SMEM

    def resident(shape):
        # Same block index every grid step -> fetched once, stays VMEM-resident.
        return pl.BlockSpec(shape, lambda i: (0, 0))

    flops = 2 * B_pad * (D0 * D1P + D1P * D2P + D2P * D3)
    bytes_accessed = (4 * B_pad * (D0 + D3)                       # x in, out (f32)
                      + 2 * (D0 * D1P + D1P * D2P + D2P * D3)     # bf16 weights
                      + 4 * (D1P + D2P + D3))                     # f32 biases

    out = pl.pallas_call(
        net_kernel,
        out_shape=jax.ShapeDtypeStruct((B_pad, D3), jnp.float32),
        grid=(n_tiles,),
        in_specs=[
            smem, smem,                                        # a1, a2
            pl.BlockSpec((TM, D0), lambda i: (i, 0)),          # x tile (pipelined)
            resident((D0, D1P)), resident((1, D1P)),           # w1, b1
            resident((D1P, D2P)), resident((1, D2P)),          # w2, b2
            resident((D2P, D3)), resident((1, D3)),            # w3, b3
        ],
        out_specs=pl.BlockSpec((TM, D3), lambda i: (i, 0)),
        compiler_params=pltpu.CompilerParams(
            dimension_semantics=("parallel",)),                # megacore on v7x
        cost_estimate=pl.CostEstimate(
            flops=flops, transcendentals=0, bytes_accessed=bytes_accessed),
    )(a1, a2, x, w1, b1, w2, b2, w3, b3)

    return out if B_pad == B else out[:B]


def init_params(key):
    """Deterministic init matching PyTorch nn.Linear shapes.

    PyTorch stores W as (out, in); we pre-transpose to (in, out) so the kernel
    computes x @ W + b. PReLU defaults: single parameter, value 0.25.
    """
    ks = jax.random.split(key, 6)

    def linear(kw, kb, fan_in, fan_out):
        bound = 1.0 / jnp.sqrt(fan_in)
        w = jax.random.uniform(kw, (fan_in, fan_out), jnp.float32, -bound, bound)
        b = jax.random.uniform(kb, (1, fan_out), jnp.float32, -bound, bound)
        return w, b

    w1, b1 = linear(ks[0], ks[1], D0, D1)
    w2, b2 = linear(ks[2], ks[3], D1, D2)
    w3, b3 = linear(ks[4], ks[5], D2, D3)
    a1 = jnp.array([0.25], dtype=jnp.float32)
    a2 = jnp.array([0.25], dtype=jnp.float32)
    return (w1, b1, w2, b2, w3, b3, a1, a2)


def reference_forward_bf16(x, params):
    """Mirrors kernel numerics: bf16 MXU operands, f32 accumulate/elementwise."""
    (w1, b1, w2, b2, w3, b3, a1, a2) = params

    def dot_bf16(a, w):
        return jnp.dot(a.astype(jnp.bfloat16), w.astype(jnp.bfloat16),
                       preferred_element_type=jnp.float32)

    h1 = dot_bf16(x, w1) + b1
    h1 = jnp.where(h1 >= 0, h1, a1[0] * h1)
    h2 = dot_bf16(h1, w2) + b2
    h2 = jnp.where(h2 >= 0, h2, a2[0] * h2)
    return dot_bf16(h2, w3) + b3


def reference_forward_f32(x, params):
    (w1, b1, w2, b2, w3, b3, a1, a2) = params
    h1 = x @ w1 + b1
    h1 = jnp.where(h1 >= 0, h1, a1[0] * h1)
    h2 = h1 @ w2 + b2
    h2 = jnp.where(h2 >= 0, h2, a2[0] * h2)
    return h2 @ w3 + b3


if __name__ == "__main__":
    key = jax.random.PRNGKey(0)
    kx, kx2, kp = jax.random.split(key, 3)

    params = init_params(kp)
    padded = pad_params(params)

    # Small batch (padded to 8 rows internally, single grid step).
    batch = 2
    x = jax.random.normal(kx, (batch, D0), dtype=jnp.float32)
    out = jax.block_until_ready(net_forward(x, padded))
    assert out.shape == (batch, D3), out.shape
    assert jnp.allclose(out, reference_forward_bf16(x, params),
                        atol=1e-2, rtol=1e-2), "mismatch vs bf16 reference (B=2)"
    assert jnp.allclose(out, reference_forward_f32(x, params),
                        atol=2e-1), "mismatch vs f32 reference (B=2)"

    # Larger batch exercising adaptive tiling: 2 tiles of 136 rows (272 padded).
    batch2 = 260
    x2 = jax.random.normal(kx2, (batch2, D0), dtype=jnp.float32)
    out2 = jax.block_until_ready(net_forward(x2, padded))
    assert out2.shape == (batch2, D3), out2.shape
    assert jnp.allclose(out2, reference_forward_bf16(x2, params),
                        atol=1e-2, rtol=1e-2), "mismatch vs bf16 reference (B=260)"

    print("KERNEL_OK")
</pallas_src>

<mosaic_0001>
module attributes {stable_mosaic.version = 11 : i64} {
  func.func @net_kernel(%arg0: i32, %arg1: memref<1xf32, #tpu.memory_space<smem>>, %arg2: memref<1xf32, #tpu.memory_space<smem>>, %arg3: memref<8x392xf32, #tpu.memory_space<vmem>>, %arg4: memref<392x512xbf16, #tpu.memory_space<vmem>>, %arg5: memref<1x512xf32, #tpu.memory_space<vmem>>, %arg6: memref<512x256xbf16, #tpu.memory_space<vmem>>, %arg7: memref<1x256xf32, #tpu.memory_space<vmem>>, %arg8: memref<256x16xbf16, #tpu.memory_space<vmem>>, %arg9: memref<1x16xf32, #tpu.memory_space<vmem>>, %arg10: memref<8x16xf32, #tpu.memory_space<vmem>>) attributes {dimension_semantics = [#tpu.dimension_semantics<parallel>], iteration_bounds = array<i64: 1>, scalar_prefetch = 0 : i64, scratch_operands = 0 : i64, tpu.core_type = #tpu.core_type<tc>, window_params = [{transform_indices = @transform_0, window_bounds = array<i64: 1>}, {transform_indices = @transform_1, window_bounds = array<i64: 1>}, {transform_indices = @transform_2, window_bounds = array<i64: 8, 392>}, {pipeline_mode = #tpu.pipeline_mode<synchronous>, transform_indices = @transform_3, window_bounds = array<i64: 392, 512>}, {pipeline_mode = #tpu.pipeline_mode<synchronous>, transform_indices = @transform_4, window_bounds = array<i64: 1, 512>}, {pipeline_mode = #tpu.pipeline_mode<synchronous>, transform_indices = @transform_5, window_bounds = array<i64: 512, 256>}, {pipeline_mode = #tpu.pipeline_mode<synchronous>, transform_indices = @transform_6, window_bounds = array<i64: 1, 256>}, {pipeline_mode = #tpu.pipeline_mode<synchronous>, transform_indices = @transform_7, window_bounds = array<i64: 256, 16>}, {pipeline_mode = #tpu.pipeline_mode<synchronous>, transform_indices = @transform_8, window_bounds = array<i64: 1, 16>}, {transform_indices = @transform_9, window_bounds = array<i64: 8, 16>}]} {
    %c0 = arith.constant 0 : index
    %c0_0 = arith.constant 0 : index
    %0 = vector.load %arg3[%c0, %c0_0] : memref<8x392xf32, #tpu.memory_space<vmem>>, vector<8x392xf32>
    %1 = arith.truncf %0 : vector<8x392xf32> to vector<8x392xbf16>
    %c0_1 = arith.constant 0 : index
    %c0_2 = arith.constant 0 : index
    %2 = vector.load %arg4[%c0_1, %c0_2] : memref<392x512xbf16, #tpu.memory_space<vmem>>, vector<392x512xbf16>
    %cst = arith.constant dense<0.000000e+00> : vector<8x512xf32>
    %3 = tpu.matmul %1, %2, %cst {dimension_numbers = #tpu.dot_dimension_numbers<[1], [0], [0], [1], [0, 0, 1, 1], [], []>} : vector<8x392xbf16>, vector<392x512xbf16>, vector<8x512xf32> -> vector<8x512xf32>
    %c0_3 = arith.constant 0 : index
    %c0_4 = arith.constant 0 : index
    %4 = vector.load %arg5[%c0_3, %c0_4] : memref<1x512xf32, #tpu.memory_space<vmem>>, vector<1x512xf32>
    %5 = vector.broadcast %4 : vector<1x512xf32> to vector<8x512xf32>
    %6 = arith.addf %3, %5 : vector<8x512xf32>
    %cst_5 = arith.constant 0.000000e+00 : f32
    %7 = vector.broadcast %cst_5 : f32 to vector<8x512xf32>
    %8 = arith.cmpf oge, %6, %7 : vector<8x512xf32>
    %c0_6 = arith.constant 0 : index
    %9 = memref.load %arg1[%c0_6] : memref<1xf32, #tpu.memory_space<smem>>
    %10 = vector.broadcast %9 : f32 to vector<8x512xf32>
    %11 = arith.mulf %10, %6 : vector<8x512xf32>
    %12 = arith.select %8, %6, %11 : vector<8x512xi1>, vector<8x512xf32>
    %13 = arith.truncf %12 : vector<8x512xf32> to vector<8x512xbf16>
    %c0_7 = arith.constant 0 : index
    %c0_8 = arith.constant 0 : index
    %14 = vector.load %arg6[%c0_7, %c0_8] : memref<512x256xbf16, #tpu.memory_space<vmem>>, vector<512x256xbf16>
    %cst_9 = arith.constant dense<0.000000e+00> : vector<8x256xf32>
    %15 = tpu.matmul %13, %14, %cst_9 {dimension_numbers = #tpu.dot_dimension_numbers<[1], [0], [0], [1], [0, 0, 1, 1], [], []>} : vector<8x512xbf16>, vector<512x256xbf16>, vector<8x256xf32> -> vector<8x256xf32>
    %c0_10 = arith.constant 0 : index
    %c0_11 = arith.constant 0 : index
    %16 = vector.load %arg7[%c0_10, %c0_11] : memref<1x256xf32, #tpu.memory_space<vmem>>, vector<1x256xf32>
    %17 = vector.broadcast %16 : vector<1x256xf32> to vector<8x256xf32>
    %18 = arith.addf %15, %17 : vector<8x256xf32>
    %cst_12 = arith.constant 0.000000e+00 : f32
    %19 = vector.broadcast %cst_12 : f32 to vector<8x256xf32>
    %20 = arith.cmpf oge, %18, %19 : vector<8x256xf32>
    %c0_13 = arith.constant 0 : index
    %21 = memref.load %arg2[%c0_13] : memref<1xf32, #tpu.memory_space<smem>>
    %22 = vector.broadcast %21 : f32 to vector<8x256xf32>
    %23 = arith.mulf %22, %18 : vector<8x256xf32>
    %24 = arith.select %20, %18, %23 : vector<8x256xi1>, vector<8x256xf32>
    %25 = arith.truncf %24 : vector<8x256xf32> to vector<8x256xbf16>
    %c0_14 = arith.constant 0 : index
    %c0_15 = arith.constant 0 : index
    %26 = vector.load %arg8[%c0_14, %c0_15] : memref<256x16xbf16, #tpu.memory_space<vmem>>, vector<256x16xbf16>
    %cst_16 = arith.constant dense<0.000000e+00> : vector<8x16xf32>
    %27 = tpu.matmul %25, %26, %cst_16 {dimension_numbers = #tpu.dot_dimension_numbers<[1], [0], [0], [1], [0, 0, 1, 1], [], []>} : vector<8x256xbf16>, vector<256x16xbf16>, vector<8x16xf32> -> vector<8x16xf32>
    %c0_17 = arith.constant 0 : index
    %c0_18 = arith.constant 0 : index
    %28 = vector.load %arg9[%c0_17, %c0_18] : memref<1x16xf32, #tpu.memory_space<vmem>>, vector<1x16xf32>
    %29 = vector.broadcast %28 : vector<1x16xf32> to vector<8x16xf32>
    %30 = arith.addf %27, %29 : vector<8x16xf32>
    %c0_19 = arith.constant 0 : index
    %c0_20 = arith.constant 0 : index
    %31 = vector.load %arg10[%c0_19, %c0_20] : memref<8x16xf32, #tpu.memory_space<vmem>>, vector<8x16xf32>
    tpu.vector_store %arg10[%c0_19, %c0_20], %30 {strides = array<i32>} : memref<8x16xf32, #tpu.memory_space<vmem>>, vector<8x16xf32>,
    return
  }
  func.func @transform_0(%arg0: i32) -> i32 {
    %c0_i32 = arith.constant 0 : i32
    %c0_i32_0 = arith.constant 0 : i32
    return %c0_i32 : i32
  }
  func.func @transform_1(%arg0: i32) -> i32 {
    %c0_i32 = arith.constant 0 : i32
    %c0_i32_0 = arith.constant 0 : i32
    return %c0_i32 : i32
  }
  func.func @transform_2(%arg0: i32) -> (i32, i32) {
    %c0_i32 = arith.constant 0 : i32
    %c0_i32_0 = arith.constant 0 : i32
    return %arg0, %c0_i32 : i32, i32
  }
  func.func @transform_3(%arg0: i32) -> (i32, i32) {
    %c0_i32 = arith.constant 0 : i32
    %c0_i32_0 = arith.constant 0 : i32
    %c0_i32_1 = arith.constant 0 : i32
    return %c0_i32, %c0_i32_0 : i32, i32
  }
  func.func @transform_4(%arg0: i32) -> (i32, i32) {
    %c0_i32 = arith.constant 0 : i32
    %c0_i32_0 = arith.constant 0 : i32
    %c0_i32_1 = arith.constant 0 : i32
    return %c0_i32, %c0_i32_0 : i32, i32
  }
  func.func @transform_5(%arg0: i32) -> (i32, i32) {
    %c0_i32 = arith.constant 0 : i32
    %c0_i32_0 = arith.constant 0 : i32
    %c0_i32_1 = arith.constant 0 : i32
    return %c0_i32, %c0_i32_0 : i32, i32
  }
  func.func @transform_6(%arg0: i32) -> (i32, i32) {
    %c0_i32 = arith.constant 0 : i32
    %c0_i32_0 = arith.constant 0 : i32
    %c0_i32_1 = arith.constant 0 : i32
    return %c0_i32, %c0_i32_0 : i32, i32
  }
  func.func @transform_7(%arg0: i32) -> (i32, i32) {
    %c0_i32 = arith.constant 0 : i32
    %c0_i32_0 = arith.constant 0 : i32
    %c0_i32_1 = arith.constant 0 : i32
    return %c0_i32, %c0_i32_0 : i32, i32
  }
  func.func @transform_8(%arg0: i32) -> (i32, i32) {
    %c0_i32 = arith.constant 0 : i32
    %c0_i32_0 = arith.constant 0 : i32
    %c0_i32_1 = arith.constant 0 : i32
    return %c0_i32, %c0_i32_0 : i32, i32
  }
  func.func @transform_9(%arg0: i32) -> (i32, i32) {
    %c0_i32 = arith.constant 0 : i32
    %c0_i32_0 = arith.constant 0 : i32
    return %arg0, %c0_i32 : i32, i32
  }
}

</mosaic_0001>

<bundles_post_ra>
// kernel: tpu_custom_call.1
= control target key start
LH: loop header
LB: loop body
LE: loop exit
PB: predicated region body
PF: predicated region fallthrough
CT: control target
= control target key end

     0   :  { %16 = vsyncpa [#allocation5], 0  ;;  %s2275_s0 = inlined_call_operand.<no memory space> [shape: f32[1], index: 0, kind: input, shape index: {}]   ;;  %s2276_s1 = inlined_call_operand.<no memory space> [shape: f32[1], index: 1, kind: input, shape index: {}]   ;;  %s2277_s2 = inlined_call_operand.vmem [shape: f32[8,392], index: 2, kind: input, shape index: {}]   ;;  %s2278_s3 = inlined_call_operand.hbm [shape: bf16[392,512], index: 3, kind: input, shape index: {}]   ;;  %s2279_s4 = inlined_call_operand.vmem [shape: f32[1,512], index: 4, kind: input, shape index: {}]   ;;  %s2280_s5 = inlined_call_operand.hbm [shape: bf16[512,256], index: 5, kind: input, shape index: {}]   ;;  %s2281_s6 = inlined_call_operand.vmem [shape: f32[1,256], index: 6, kind: input, shape index: {}]   ;;  %s2282_s7 = inlined_call_operand.vmem [shape: bf16[256,16], index: 7, kind: input, shape index: {}]   ;;  %s2283_s8 = inlined_call_operand.vmem [shape: f32[1,16], index: 8, kind: input, shape index: {}]   ;;  %s2284_s9 = inlined_call_operand.hbm [shape: f32[8,16], index: 9, kind: output, shape index: {}]  }
   0x1   :  { %17 = vsyncpa [#allocation8], 0 }
   0x2   :  { %18 = vsyncpa [#allocation6], 0  ;;  %s2102_s30 = smov [#allocation4]  }
   0x3   :  { %s30_s10 = sshll.u32 %s2102_s30, 4  ;;  %s31_s10 = int_to_ptr.vmem [resolvable:$true] %s30_s10 }
   0x4   :  { %s2044_s11 = scalar_lea.vmem %s31_s10, 12544  ;;  %p2049_p1 = scmp.lt.s32.totalorder %s31_s10, %s31_s10 }
   0x5   :  { %p2045_p0 = scmp.ne.s32.totalorder %s31_s10, %s2044_s11  ;;  %p2050_p2 = scmp.lt.s32.totalorder %s2044_s11, %s2044_s11 }
   0x7   :  { %p2051_p3 = por %p2050_p2, %p2049_p1 }
   0x9   :  { %p2052_p4 = pnand %p2051_p3, %p2045_p0 }
   0xb   :  { %2055 = shalt.err (!%p2052_p4)
}
   0xc   :  { %s2103_s12 = smov 256   ;;  %s2104_s13 = smov 16  }
   0xd   :  { %36 = dma.hbm_to_vmem [thread:$0]  %s2278_s3, 12544, %s31_s10, [#allocation5], %s2103_s12, %s2103_s12, %s2104_s13  }
   0xe   :  { %s2105_s16 = smov [#allocation7]  }
   0xf   :  { %s44_s17 = sshll.u32 %s2105_s16, 4  ;;  %s45_s17 = int_to_ptr.vmem [resolvable:$true] %s44_s17 }
  0x10   :  { %s2064_s18 = scalar_lea.vmem %s45_s17, 8192  ;;  %p2069_p6 = scmp.lt.s32.totalorder %s45_s17, %s45_s17 }
  0x11   :  { %p2065_p5 = scmp.ne.s32.totalorder %s45_s17, %s2064_s18  ;;  %p2070_p7 = scmp.lt.s32.totalorder %s2064_s18, %s2064_s18 }
  0x13   :  { %p2071_p8 = por %p2070_p7, %p2069_p6 }
  0x15   :  { %p2072_p9 = pnand %p2071_p8, %p2065_p5 }
  0x17   :  { %2075 = shalt.err (!%p2072_p9)
}
  0x18   :  { %s2106_s19 = smov 128   ;;  %s2107_s20 = smov 8  }
  0x19   :  { %50 = dma.hbm_to_vmem [thread:$0]  %s2280_s5, 8192, %s45_s17, [#allocation8], %s2106_s19, %s2106_s19, %s2107_s20  }
  0x1a   :  { %2096 = dma.done.wait [#allocation5], 12544  }
  0x1b   :  { %2097 = vsyncadd [#allocation5], 4294954752 }
  0x1c   :  { %2098 = dma.done.wait [#allocation8], 8192  }
  0x1d   :  { %2099 = vsyncadd [#allocation8], 4294959104  ;;  %v1776_v0 = vld [vmem:[#allocation4 + $0xe4] ss:$16 sps:$4 sm:$0xff]   ;;  %v1780_v2 = vld [vmem:[#allocation4 + $0xe0] ss:$16 sps:$4 sm:$0xff]  }
  0x1e   :  { %v1778_v1 = vld [vmem:[#allocation4 + $0x2e4] ss:$16 sps:$4 sm:$0xff]   ;;  %699 = vmatprep.subr.bf16.mxu0 %v1776_v0  ;;  %v1781_v3 = vld [vmem:[#allocation4 + $0x2e0] ss:$16 sps:$4 sm:$0xff]   ;;  %v67_v26 = vld [vmem:[%s2277_s2 + $0x18] sm:$0xff]  ;;  %vm682_vm0 = vcmask 64512  }
  0x1f   :  { %740 = vmatprep.subr.bf16.mxu1 %v1778_v1  ;;  %v1782_v4 = vld [vmem:[#allocation4 + $0xc4] ss:$16 sps:$4 sm:$0xff]   ;;  %700 = vmatpush1.bf16.msra.mxu0 %v1780_v2  ;;  %v1786_v6 = vld [vmem:[#allocation4 + $0xc0] ss:$16 sps:$4 sm:$0xff]   ;;  %v2168_v29 = vpack.c.bf16 %v67_v26, %v67_v26  ;;  %vm686_vm1 = vcmask 1043456   ;;  %v65_v52 = vld [vmem:[%s2277_s2 + $0x8] sm:$0xff] }
  0x20   :  { %741 = vmatpush1.bf16.msra.mxu1 %v1781_v3  ;;  %v1784_v5 = vld [vmem:[#allocation4 + $0x2c4] ss:$16 sps:$4 sm:$0xff]   ;;  %701 = vmatprep.subr.bf16.mxu0 %v1782_v4  ;;  %v1787_v7 = vld [vmem:[#allocation4 + $0x2c0] ss:$16 sps:$4 sm:$0xff]   ;;  %v1833_v42 = vld [vmem:[#allocation4 + $0xec] ss:$16 sps:$4 sm:$0xff]   ;;  %v69_v54 = vpack.c.bf16 %v65_v52, %v65_v52 }
  0x21   :  { %742 = vmatprep.subr.bf16.mxu1 %v1784_v5  ;;  %v1788_v8 = vld [vmem:[#allocation4 + $0xa4] ss:$16 sps:$4 sm:$0xff]   ;;  %v1792_v10 = vld [vmem:[#allocation4 + $0xa0] ss:$16 sps:$4 sm:$0xff]   ;;  %1663 = vmatprep.mubr.msk.bf16.mxu1 %vm682_vm0, %v2168_v29  ;;  %v1831_v44 = vld [vmem:[#allocation4 + $0xe8] ss:$16 sps:$4 sm:$0xff]  }
  0x22   :  { %v1790_v9 = vld [vmem:[#allocation4 + $0x2a4] ss:$16 sps:$4 sm:$0xff]   ;;  %v1793_v11 = vld [vmem:[#allocation4 + $0x2a0] ss:$16 sps:$4 sm:$0xff]   ;;  %v1839_v47 = vld [vmem:[#allocation4 + $0xcc] ss:$16 sps:$4 sm:$0xff]   ;;  %731 = vmatprep.mubr.bf16.mxu0 %v69_v54 }
  0x23   :  { %702 = vmatpush1.bf16.msra.mxu0 %v1786_v6  ;;  %v1794_v12 = vld [vmem:[#allocation4 + $0x84] ss:$16 sps:$4 sm:$0xff]   ;;  %v1798_v14 = vld [vmem:[#allocation4 + $0x80] ss:$16 sps:$4 sm:$0xff]   ;;  %v1837_v48 = vld [vmem:[#allocation4 + $0xc8] ss:$16 sps:$4 sm:$0xff]  }
  0x24   :  { %743 = vmatpush1.bf16.msra.mxu1 %v1787_v7  ;;  %703 = vmatprep.subr.bf16.mxu0 %v1788_v8  ;;  %v1796_v13 = vld [vmem:[#allocation4 + $0x284] ss:$16 sps:$4 sm:$0xff]   ;;  %v1799_v15 = vld [vmem:[#allocation4 + $0x280] ss:$16 sps:$4 sm:$0xff]   ;;  %v1845_v51 = vld [vmem:[#allocation4 + $0xac] ss:$16 sps:$4 sm:$0xff]  }
  0x25   :  { %744 = vmatprep.subr.bf16.mxu1 %v1790_v9  ;;  %v1800_v16 = vld [vmem:[#allocation4 + $0x64] ss:$16 sps:$4 sm:$0xff]   ;;  %v1804_v18 = vld [vmem:[#allocation4 + $0x60] ss:$16 sps:$4 sm:$0xff]   ;;  %v1843_v53 = vld [vmem:[#allocation4 + $0xa8] ss:$16 sps:$4 sm:$0xff]  }
  0x26   :  { %v1802_v17 = vld [vmem:[#allocation4 + $0x264] ss:$16 sps:$4 sm:$0xff]   ;;  %v1805_v19 = vld [vmem:[#allocation4 + $0x260] ss:$16 sps:$4 sm:$0xff]   ;;  %v1851_v57 = vld [vmem:[#allocation4 + $0x8c] ss:$16 sps:$4 sm:$0xff]  }
  0x27   :  { %704 = vmatpush1.bf16.msra.mxu0 %v1792_v10  ;;  %v1806_v20 = vld [vmem:[#allocation4 + $0x44] ss:$16 sps:$4 sm:$0xff]   ;;  %v1810_v22 = vld [vmem:[#allocation4 + $0x40] ss:$16 sps:$4 sm:$0xff]   ;;  %v1849_v58 = vld [vmem:[#allocation4 + $0x88] ss:$16 sps:$4 sm:$0xff]  }
  0x28   :  { %745 = vmatpush1.bf16.msra.mxu1 %v1793_v11  ;;  %705 = vmatprep.subr.bf16.mxu0 %v1794_v12  ;;  %v1808_v21 = vld [vmem:[#allocation4 + $0x244] ss:$16 sps:$4 sm:$0xff]   ;;  %v1811_v23 = vld [vmem:[#allocation4 + $0x240] ss:$16 sps:$4 sm:$0xff]   ;;  %v1857_v61 = vld [vmem:[#allocation4 + $0x6c] ss:$16 sps:$4 sm:$0xff]  }
  0x29   :  { %746 = vmatprep.subr.bf16.mxu1 %v1796_v13  ;;  %v1812_v24 = vld [vmem:[#allocation4 + $0x24] ss:$16 sps:$4 sm:$0xff]   ;;  %v1816_v27 = vld [vmem:[#allocation4 + $0x20] ss:$16 sps:$4 sm:$0xff]   ;;  %v1855_v62 = vld [vmem:[#allocation4 + $0x68] ss:$16 sps:$4 sm:$0xff]  }
  0x2a   :  { %v1814_v25 = vld [vmem:[#allocation4 + $0x224] ss:$16 sps:$4 sm:$0xff]   ;;  %v1817_v28 = vld [vmem:[#allocation4 + $0x220] ss:$16 sps:$4 sm:$0xff]   ;;  %v1863_v1 = vld [vmem:[#allocation4 + $0x4c] ss:$16 sps:$4 sm:$0xff]  }
  0x2b   :  { %706 = vmatpush1.bf16.msra.mxu0 %v1798_v14  ;;  %v1818_v30 = vld [vmem:[#allocation4 + $0x4] ss:$16 sps:$4 sm:$0xff]   ;;  %v1822_v33 = vld [vmem:[#allocation4] ss:$16 sps:$4 sm:$0xff]   ;;  %v1861_v2 = vld [vmem:[#allocation4 + $0x48] ss:$16 sps:$4 sm:$0xff]  }
  0x2c   :  { %747 = vmatpush1.bf16.msra.mxu1 %v1799_v15  ;;  %707 = vmatprep.subr.bf16.mxu0 %v1800_v16  ;;  %v1820_v31 = vld [vmem:[#allocation4 + $0x204] ss:$16 sps:$4 sm:$0xff]   ;;  %v1823_v34 = vld [vmem:[#allocation4 + $0x200] ss:$16 sps:$4 sm:$0xff]   ;;  %v1869_v5 = vld [vmem:[#allocation4 + $0x2c] ss:$16 sps:$4 sm:$0xff]  }
  0x2d   :  { %748 = vmatprep.subr.bf16.mxu1 %v1802_v17  ;;  %v168_v32 = vld [vmem:[#allocation4 + $0x300] sm:$0xff]  ;;  %v66_v39 = vld [vmem:[%s2277_s2 + $0x10] sm:$0xff]  ;;  %v1867_v6 = vld [vmem:[#allocation4 + $0x28] ss:$16 sps:$4 sm:$0xff]   ;;  %vm1544_vm8 = vcmask 130048  }
  0x2e   :  { %v1824_v35 = vld [vmem:[#allocation4 + $0x1e4] ss:$16 sps:$4 sm:$0xff]   ;;  %v1659_v36 = vcombine.high %v168_v32, %v168_v32  ;;  %v1658_v37 = vcombine.low %v168_v32, %v168_v32  ;;  %v1827_v38 = vld [vmem:[#allocation4 + $0x1e0] ss:$16 sps:$4 sm:$0xff]   ;;  %v2177_v43 = vpack.c.bf16 %v66_v39, %v66_v39  ;;  %v1873_v9 = vld [vmem:[#allocation4 + $0xc] ss:$16 sps:$4 sm:$0xff]  }
  0x2f   :  { %708 = vmatpush1.bf16.msra.mxu0 %v1804_v18  ;;  %v1829_v41 = vld [vmem:[#allocation4 + $0x1c4] ss:$16 sps:$4 sm:$0xff]   ;;  %v1834_v45 = vld [vmem:[#allocation4 + $0x1c0] ss:$16 sps:$4 sm:$0xff]   ;;  %v1876_v10 = vld [vmem:[#allocation4 + $0x2ec] ss:$16 sps:$4 sm:$0xff]  }
  0x30   :  { %749 = vmatpush1.bf16.msra.mxu1 %v1805_v19  ;;  %709 = vmatprep.subr.bf16.mxu0 %v1806_v20  ;;  %v688_v40 = vsel %vm686_vm1, %v1658_v37, 0  ;;  %v1835_v46 = vld [vmem:[#allocation4 + $0x1a4] ss:$16 sps:$4 sm:$0xff]   ;;  %v1840_v49 = vld [vmem:[#allocation4 + $0x1a0] ss:$16 sps:$4 sm:$0xff]  }
  0x31   :  { %750 = vmatprep.subr.bf16.mxu1 %v1808_v21  ;;  %v1841_v50 = vld [vmem:[#allocation4 + $0x184] ss:$16 sps:$4 sm:$0xff]   ;;  %v1846_v55 = vld [vmem:[#allocation4 + $0x180] ss:$16 sps:$4 sm:$0xff]   ;;  %v1871_v12 = vld [vmem:[#allocation4 + $0x8] ss:$16 sps:$4 sm:$0xff]  }
  0x32   :  { %v1847_v56 = vld [vmem:[#allocation4 + $0x164] ss:$16 sps:$4 sm:$0xff]   ;;  %v1852_v59 = vld [vmem:[#allocation4 + $0x160] ss:$16 sps:$4 sm:$0xff]   ;;  %v1874_v13 = vld [vmem:[#allocation4 + $0x2e8] ss:$16 sps:$4 sm:$0xff]  }
  0x33   :  { %710 = vmatpush1.bf16.msra.mxu0 %v1810_v22  ;;  %v1853_v60 = vld [vmem:[#allocation4 + $0x144] ss:$16 sps:$4 sm:$0xff]   ;;  %v1858_v63 = vld [vmem:[#allocation4 + $0x140] ss:$16 sps:$4 sm:$0xff]   ;;  %v1879_v14 = vld [vmem:[#allocation4 + $0x1ec] ss:$16 sps:$4 sm:$0xff]  }
  0x34   :  { %751 = vmatpush1.bf16.msra.mxu1 %v1811_v23  ;;  %711 = vmatprep.subr.bf16.mxu0 %v1812_v24  ;;  %v1859_v0 = vld [vmem:[#allocation4 + $0x124] ss:$16 sps:$4 sm:$0xff]   ;;  %v1864_v3 = vld [vmem:[#allocation4 + $0x120] ss:$16 sps:$4 sm:$0xff]   ;;  %v1882_v15 = vld [vmem:[#allocation4 + $0x2cc] ss:$16 sps:$4 sm:$0xff]  }
  0x35   :  { %752 = vmatprep.subr.bf16.mxu1 %v1814_v25  ;;  %v1865_v4 = vld [vmem:[#allocation4 + $0x104] ss:$16 sps:$4 sm:$0xff]   ;;  %v1870_v7 = vld [vmem:[#allocation4 + $0x100] ss:$16 sps:$4 sm:$0xff]   ;;  %v1877_v16 = vld [vmem:[#allocation4 + $0x1e8] ss:$16 sps:$4 sm:$0xff]  }
  0x36   :  { %v64_v8 = vld [vmem:[%s2277_s2] sm:$0xff]  ;;  %v1880_v17 = vld [vmem:[#allocation4 + $0x2c8] ss:$16 sps:$4 sm:$0xff]   ;;  %v1885_v18 = vld [vmem:[#allocation4 + $0x1cc] ss:$16 sps:$4 sm:$0xff]  }
  0x37   :  { %712 = vmatpush1.bf16.msra.mxu0 %v1816_v27  ;;  %v2186_v11 = vpack.c.bf16 %v64_v8, %v64_v8  ;;  %v1888_v19 = vld [vmem:[#allocation4 + $0x2ac] ss:$16 sps:$4 sm:$0xff]   ;;  %v1883_v20 = vld [vmem:[#allocation4 + $0x1c8] ss:$16 sps:$4 sm:$0xff]  }
  0x38   :  { %753 = vmatpush1.bf16.msra.mxu1 %v1817_v28  ;;  %713 = vmatprep.subr.bf16.mxu0 %v1818_v30  ;;  %v1886_v21 = vld [vmem:[#allocation4 + $0x2a8] ss:$16 sps:$4 sm:$0xff]   ;;  %v1891_v22 = vld [vmem:[#allocation4 + $0x1ac] ss:$16 sps:$4 sm:$0xff]  }
  0x39   :  { %754 = vmatprep.subr.bf16.mxu1 %v1820_v31  ;;  %v1894_v23 = vld [vmem:[#allocation4 + $0x28c] ss:$16 sps:$4 sm:$0xff]   ;;  %v1889_v24 = vld [vmem:[#allocation4 + $0x1a8] ss:$16 sps:$4 sm:$0xff]  }
  0x3a   :  { %v1892_v25 = vld [vmem:[#allocation4 + $0x288] ss:$16 sps:$4 sm:$0xff]   ;;  %v1897_v26 = vld [vmem:[#allocation4 + $0x18c] ss:$16 sps:$4 sm:$0xff]  }
  0x3b   :  { %714 = vmatpush1.bf16.msra.mxu0 %v1822_v33  ;;  %v1900_v27 = vld [vmem:[#allocation4 + $0x26c] ss:$16 sps:$4 sm:$0xff]   ;;  %v1895_v28 = vld [vmem:[#allocation4 + $0x188] ss:$16 sps:$4 sm:$0xff]  }
  0x3c   :  { %755 = vmatpush1.bf16.msra.mxu1 %v1823_v34  ;;  %715 = vmatprep.subr.bf16.mxu0 %v1824_v35  ;;  %v1898_v30 = vld [vmem:[#allocation4 + $0x268] ss:$16 sps:$4 sm:$0xff]   ;;  %v1903_v31 = vld [vmem:[#allocation4 + $0x16c] ss:$16 sps:$4 sm:$0xff]  }
  0x3d   :  { %1662 = vmatprep.subr.msk.bf16.mxu1 %vm686_vm1, %v1659_v36  ;;  %v1901_v32 = vld [vmem:[#allocation4 + $0x168] ss:$16 sps:$4 sm:$0xff]   ;;  %v1909_v35 = vld [vmem:[#allocation4 + $0x14c] ss:$16 sps:$4 sm:$0xff]  }
  0x3e   :  { %v1904_v33 = vld [vmem:[#allocation4 + $0x248] ss:$16 sps:$4 sm:$0xff]   ;;  %v1912_v36 = vld [vmem:[#allocation4 + $0x22c] ss:$16 sps:$4 sm:$0xff]  }
  0x3f   :  { %716 = vmatpush2.bf16.msra.mxu0 %v1827_v38  ;;  %v169_v34 = vld [vmem:[#allocation4 + $0x308] sm:$0xff]  ;;  %v1927_v52 = vld [vmem:[#allocation7 + $0x60] ss:$8 sps:$4 sm:$0xff]  }
  0x40   :  { %771 = vmatpush2.bf16.msra.mxu1 %v688_v40  ;;  %717 = vmatprep.subr.bf16.mxu0 %v1829_v41  ;;  %v1907_v37 = vld [vmem:[#allocation4 + $0x148] ss:$16 sps:$4 sm:$0xff]   ;;  %v1915_v39 = vld [vmem:[#allocation4 + $0x12c] ss:$16 sps:$4 sm:$0xff]   ;;  %v1660_v41 = vcombine.low %v169_v34, %v169_v34 }
  0x41   :  { %781 = vmatprep.subr.bf16.mxu1 %v1833_v42  ;;  %v1910_v38 = vld [vmem:[#allocation4 + $0x228] ss:$16 sps:$4 sm:$0xff]   ;;  %v1918_v40 = vld [vmem:[#allocation4 + $0x20c] ss:$16 sps:$4 sm:$0xff]  }
  0x42   :  { %v1913_v42 = vld [vmem:[#allocation4 + $0x128] ss:$16 sps:$4 sm:$0xff]   ;;  %v1950_v8 = vld [vmem:[#allocation7 + $0xf4] ss:$8 sps:$4 sm:$0xff]  }
  0x43   :  { %773 = vmatmul.mubr.bf16.vlgmr.msra.gmra.mxu1 %v2177_v43  ;;  %718 = vmatpush2.bf16.msra.mxu0 %v1834_v45  ;;  %v1921_v45 = vld [vmem:[#allocation4 + $0x10c] ss:$16 sps:$4 sm:$0xff]  }
  0x44   :  { %782 = vmatpush1.bf16.msra.mxu1 %v1831_v44  ;;  %719 = vmatprep.subr.bf16.mxu0 %v1835_v46  ;;  %v1916_v44 = vld [vmem:[#allocation4 + $0x208] ss:$16 sps:$4 sm:$0xff]   ;;  %v694_v46 = vsel %vm686_vm1, %v1660_v41, 0 }
  0x45   :  { %783 = vmatprep.subr.bf16.mxu1 %v1839_v47  ;;  %813 = vmatprep.mubr.bf16.mxu1 %v69_v54  ;;  %v1661_v47 = vcombine.high %v169_v34, %v169_v34  ;;  %v1930_v54 = vld [vmem:[#allocation7 + $0x50] ss:$8 sps:$4 sm:$0xff]  }
  0x46   :  { %v2002_v34 = vld [vmem:[#allocation7 + $0x1d0] ss:$8 sps:$4 sm:$0xff]  }
  0x47   :  { %720 = vmatpush2.bf16.msra.mxu0 %v1840_v49  ;;  %v1926_v49 = vld [vmem:[#allocation7 + $0x74] ss:$8 sps:$4 sm:$0xff]   ;;  %v2008_v41 = vld [vmem:[#allocation7 + $0x1b0] ss:$8 sps:$4 sm:$0xff]  }
  0x48   :  { %784 = vmatpush1.bf16.msra.mxu1 %v1837_v48  ;;  %721 = vmatprep.subr.bf16.mxu0 %v1841_v50  ;;  %v1919_v48 = vld [vmem:[#allocation4 + $0x108] ss:$16 sps:$4 sm:$0xff]  }
  0x49   :  { %785 = vmatprep.subr.bf16.mxu1 %v1845_v51  ;;  %v1924_v50 = vld [vmem:[#allocation7 + $0x70] ss:$8 sps:$4 sm:$0xff]   ;;  %v1929_v51 = vld [vmem:[#allocation7 + $0x64] ss:$8 sps:$4 sm:$0xff]  }
  0x4b   :  { %722 = vmatpush2.bf16.msra.mxu0 %v1846_v55  ;;  %v1935_v55 = vld [vmem:[#allocation7 + $0x44] ss:$8 sps:$4 sm:$0xff]  }
  0x4c   :  { %786 = vmatpush1.bf16.msra.mxu1 %v1843_v53  ;;  %723 = vmatprep.subr.bf16.mxu0 %v1847_v56  ;;  %v1932_v53 = vld [vmem:[#allocation7 + $0x54] ss:$8 sps:$4 sm:$0xff]   ;;  %v1954_v56 = vld [vmem:[#allocation7 + $0x170] ss:$8 sps:$4 sm:$0xff]  }
  0x4d   :  { %787 = vmatprep.subr.bf16.mxu1 %v1851_v57  ;;  %v1956_v57 = vld [vmem:[#allocation7 + $0x174] ss:$8 sps:$4 sm:$0xff]  }
  0x4f   :  { %724 = vmatpush2.bf16.msra.mxu0 %v1852_v59  ;;  %v1962_v59 = vld [vmem:[#allocation7 + $0x164] ss:$8 sps:$4 sm:$0xff]  }
  0x50   :  { %788 = vmatpush1.bf16.msra.mxu1 %v1849_v58  ;;  %725 = vmatprep.subr.bf16.mxu0 %v1853_v60  ;;  %v1933_v58 = vld [vmem:[#allocation7 + $0x40] ss:$8 sps:$4 sm:$0xff]   ;;  %v1938_v60 = vld [vmem:[#allocation7 + $0x34] ss:$8 sps:$4 sm:$0xff]  }
  0x51   :  { %789 = vmatprep.subr.bf16.mxu1 %v1857_v61  ;;  %v1960_v61 = vld [vmem:[#allocation7 + $0x160] ss:$8 sps:$4 sm:$0xff]  }
  0x53   :  { %726 = vmatpush2.bf16.msra.mxu0 %v1858_v63  ;;  %v1941_v63 = vld [vmem:[#allocation7 + $0x24] ss:$8 sps:$4 sm:$0xff]  }
  0x54   :  { %790 = vmatpush1.bf16.msra.mxu1 %v1855_v62  ;;  %727 = vmatprep.subr.bf16.mxu0 %v1859_v0  ;;  %v1936_v62 = vld [vmem:[#allocation7 + $0x30] ss:$8 sps:$4 sm:$0xff]  }
  0x55   :  { %791 = vmatprep.subr.bf16.mxu1 %v1863_v1  ;;  %v1966_v0 = vld [vmem:[#allocation7 + $0x150] ss:$8 sps:$4 sm:$0xff]   ;;  %v1974_v1 = vld [vmem:[#allocation7 + $0x144] ss:$8 sps:$4 sm:$0xff]  }
  0x57   :  { %728 = vmatpush2.bf16.msra.mxu0 %v1864_v3  ;;  %v1944_v3 = vld [vmem:[#allocation7 + $0x14] ss:$8 sps:$4 sm:$0xff]  }
  0x58   :  { %792 = vmatpush1.bf16.msra.mxu1 %v1861_v2  ;;  %729 = vmatprep.subr.bf16.mxu0 %v1865_v4  ;;  %v1939_v2 = vld [vmem:[#allocation7 + $0x20] ss:$8 sps:$4 sm:$0xff]  }
  0x59   :  { %793 = vmatprep.subr.bf16.mxu1 %v1869_v5  ;;  %v1972_v4 = vld [vmem:[#allocation7 + $0x140] ss:$8 sps:$4 sm:$0xff]   ;;  %v1942_v5 = vld [vmem:[#allocation7 + $0x10] ss:$8 sps:$4 sm:$0xff]  }
  0x5b   :  { %730 = vmatpush2.bf16.msra.mxu0 %v1870_v7  ;;  %v1945_v7 = vld [vmem:[#allocation7] ss:$8 sps:$4 sm:$0xff]  }
  0x5c   :  { %794 = vmatpush1.bf16.msra.mxu1 %v1867_v6  ;;  %822 = vmatprep.subr.bf16.mxu0 %v1876_v10  ;;  %v1947_v6 = vld [vmem:[#allocation7 + $0x4] ss:$8 sps:$4 sm:$0xff]   ;;  %v1978_v10 = vld [vmem:[#allocation7 + $0x130] ss:$8 sps:$4 sm:$0xff]  }
  0x5d   :  { %795 = vmatprep.subr.bf16.mxu1 %v1873_v9  ;;  %v1980_v9 = vld [vmem:[#allocation7 + $0x134] ss:$8 sps:$4 sm:$0xff]  }
  0x5e   :  { %732 = vmatmul.mubr.bf16.vlgmr.msra.gmra.mxu0 %v2186_v11 }
  0x5f   :  { %823 = vmatpush1.bf16.msra.mxu0 %v1874_v13  ;;  %1665 = vmatprep.mubr.msk.bf16.mxu0 %vm682_vm0, %v2168_v29  ;;  %v1906_v29 = vld [vmem:[#allocation4 + $0x24c] ss:$16 sps:$4 sm:$0xff]  }
  0x60   :  { %796 = vmatpush1.bf16.msra.mxu1 %v1871_v12  ;;  %824 = vmatprep.subr.bf16.mxu0 %v1882_v15  ;;  %v1953_v12 = vld [vmem:[#allocation7 + $0xe4] ss:$8 sps:$4 sm:$0xff]   ;;  %v1951_v15 = vld [vmem:[#allocation7 + $0xe0] ss:$8 sps:$4 sm:$0xff]  }
  0x61   :  { %797 = vmatprep.subr.bf16.mxu1 %v1879_v14  ;;  %v1986_v13 = vld [vmem:[#allocation7 + $0x124] ss:$8 sps:$4 sm:$0xff]   ;;  %v1984_v14 = vld [vmem:[#allocation7 + $0x120] ss:$8 sps:$4 sm:$0xff]  }
  0x63   :  { %825 = vmatpush1.bf16.msra.mxu0 %v1880_v17  ;;  %v1992_v17 = vld [vmem:[#allocation7 + $0x114] ss:$8 sps:$4 sm:$0xff]  }
  0x64   :  { %798 = vmatpush2.bf16.msra.mxu1 %v1877_v16  ;;  %826 = vmatprep.subr.bf16.mxu0 %v1888_v19  ;;  %v1959_v16 = vld [vmem:[#allocation7 + $0xd4] ss:$8 sps:$4 sm:$0xff]   ;;  %v1957_v19 = vld [vmem:[#allocation7 + $0xd0] ss:$8 sps:$4 sm:$0xff]  }
  0x65   :  { %799 = vmatprep.subr.bf16.mxu1 %v1885_v18  ;;  %v1990_v18 = vld [vmem:[#allocation7 + $0x110] ss:$8 sps:$4 sm:$0xff]  }
  0x67   :  { %827 = vmatpush1.bf16.msra.mxu0 %v1886_v21  ;;  %v1995_v21 = vld [vmem:[#allocation7 + $0x104] ss:$8 sps:$4 sm:$0xff]  }
  0x68   :  { %800 = vmatpush2.bf16.msra.mxu1 %v1883_v20  ;;  %828 = vmatprep.subr.bf16.mxu0 %v1894_v23  ;;  %v1965_v20 = vld [vmem:[#allocation7 + $0xc4] ss:$8 sps:$4 sm:$0xff]   ;;  %v1963_v23 = vld [vmem:[#allocation7 + $0xc0] ss:$8 sps:$4 sm:$0xff]  }
  0x69   :  { %801 = vmatprep.subr.bf16.mxu1 %v1891_v22  ;;  %v1993_v22 = vld [vmem:[#allocation7 + $0x100] ss:$8 sps:$4 sm:$0xff]  }
  0x6b   :  { %829 = vmatpush1.bf16.msra.mxu0 %v1892_v25  ;;  %v1971_v25 = vld [vmem:[#allocation7 + $0xb4] ss:$8 sps:$4 sm:$0xff]  }
  0x6c   :  { %802 = vmatpush2.bf16.msra.mxu1 %v1889_v24  ;;  %830 = vmatprep.subr.bf16.mxu0 %v1900_v27  ;;  %v1998_v24 = vld [vmem:[#allocation7 + $0x1f4] ss:$8 sps:$4 sm:$0xff]   ;;  %v2001_v27 = vld [vmem:[#allocation7 + $0x1e4] ss:$8 sps:$4 sm:$0xff]  }
  0x6d   :  { %803 = vmatprep.subr.bf16.mxu1 %v1897_v26  ;;  %v1996_v26 = vld [vmem:[#allocation7 + $0x1f0] ss:$8 sps:$4 sm:$0xff]  }
  0x6f   :  { %831 = vmatpush1.bf16.msra.mxu0 %v1898_v30  ;;  %v1977_v30 = vld [vmem:[#allocation7 + $0xa4] ss:$8 sps:$4 sm:$0xff]  }
  0x70   :  { %804 = vmatpush2.bf16.msra.mxu1 %v1895_v28  ;;  %832 = vmatprep.subr.bf16.mxu0 %v1906_v29  ;;  %v1969_v28 = vld [vmem:[#allocation7 + $0xb0] ss:$8 sps:$4 sm:$0xff]   ;;  %v2004_v29 = vld [vmem:[#allocation7 + $0x1d4] ss:$8 sps:$4 sm:$0xff]  }
  0x71   :  { %805 = vmatprep.subr.bf16.mxu1 %v1903_v31  ;;  %v1999_v31 = vld [vmem:[#allocation7 + $0x1e0] ss:$8 sps:$4 sm:$0xff]  }
  0x73   :  { %833 = vmatpush1.bf16.msra.mxu0 %v1904_v33  ;;  %v1983_v33 = vld [vmem:[#allocation7 + $0x94] ss:$8 sps:$4 sm:$0xff]  }
  0x74   :  { %806 = vmatpush2.bf16.msra.mxu1 %v1901_v32  ;;  %834 = vmatprep.subr.bf16.mxu0 %v1912_v36  ;;  %v1975_v32 = vld [vmem:[#allocation7 + $0xa0] ss:$8 sps:$4 sm:$0xff]   ;;  %v1981_v36 = vld [vmem:[#allocation7 + $0x90] ss:$8 sps:$4 sm:$0xff]  }
  0x75   :  { %807 = vmatprep.subr.bf16.mxu1 %v1909_v35  ;;  %v2007_v35 = vld [vmem:[#allocation7 + $0x1c4] ss:$8 sps:$4 sm:$0xff]  }
  0x77   :  { %835 = vmatpush1.bf16.msra.mxu0 %v1910_v38  ;;  %v2005_v38 = vld [vmem:[#allocation7 + $0x1c0] ss:$8 sps:$4 sm:$0xff]  }
  0x78   :  { %808 = vmatpush2.bf16.msra.mxu1 %v1907_v37  ;;  %836 = vmatprep.subr.bf16.mxu0 %v1918_v40  ;;  %v1989_v37 = vld [vmem:[#allocation7 + $0x84] ss:$8 sps:$4 sm:$0xff]   ;;  %v1987_v40 = vld [vmem:[#allocation7 + $0x80] ss:$8 sps:$4 sm:$0xff]  }
  0x79   :  { %809 = vmatprep.subr.bf16.mxu1 %v1915_v39  ;;  %v2010_v39 = vld [vmem:[#allocation7 + $0x1b4] ss:$8 sps:$4 sm:$0xff]  }
  0x7b   :  { %837 = vmatpush1.bf16.msra.mxu0 %v1916_v44  ;;  %v2011_v44 = vld [vmem:[#allocation7 + $0x1a0] ss:$8 sps:$4 sm:$0xff]  }
  0x7c   :  { %810 = vmatpush2.bf16.msra.mxu1 %v1913_v42  ;;  %1664 = vmatprep.subr.msk.bf16.mxu0 %vm686_vm1, %v1661_v47  ;;  %v2013_v42 = vld [vmem:[#allocation7 + $0x1a4] ss:$8 sps:$4 sm:$0xff]  }
  0x7d   :  { %811 = vmatprep.subr.bf16.mxu1 %v1921_v45  ;;  %v2016_v45 = vld [vmem:[#allocation7 + $0x194] ss:$8 sps:$4 sm:$0xff]   ;;  %v2019_v47 = vld [vmem:[#allocation7 + $0x184] ss:$8 sps:$4 sm:$0xff]  }
  0x7f   :  { %853 = vmatpush2.bf16.msra.mxu0 %v694_v46  ;;  %v2014_v46 = vld [vmem:[#allocation7 + $0x190] ss:$8 sps:$4 sm:$0xff]  }
  0x80   :  { %812 = vmatpush2.bf16.msra.mxu1 %v1919_v48  ;;  %1277 = vmatprep.subr.bf16.mxu0 %v1926_v49  ;;  %v2017_v48 = vld [vmem:[#allocation7 + $0x180] ss:$8 sps:$4 sm:$0xff]  }
  0x81   :  { %1318 = vmatprep.subr.bf16.mxu1 %v1956_v57 }
  0x82   :  { %855 = vmatmul.mubr.bf16.vlgmr.msra.gmra.mxu0 %v2177_v43  ;;  %v1968_v43 = vld [vmem:[#allocation7 + $0x154] ss:$8 sps:$4 sm:$0xff]  }
  0x83   :  { %814 = vmatmul.mubr.bf16.vlgmr.msra.gmra.mxu1 %v2186_v11  ;;  %1278 = vmatpush1.bf16.msra.mxu0 %v1924_v50  ;;  %v1948_v11 = vld [vmem:[#allocation7 + $0xf0] ss:$8 sps:$4 sm:$0xff]  }
  0x84   :  { %1279 = vmatprep.subr.bf16.mxu0 %v1929_v51  ;;  %1319 = vmatpush1.bf16.msra.mxu1 %v1954_v56  ;;  %v170_v56 = vld [vmem:[%s2279_s4] sm:$0xf] }
  0x85   :  { %1320 = vmatprep.subr.bf16.mxu1 %v1962_v59 }
  0x87   :  { %1280 = vmatpush1.bf16.msra.mxu0 %v1927_v52 }
  0x88   :  { %1281 = vmatprep.subr.bf16.mxu0 %v1932_v53  ;;  %1321 = vmatpush1.bf16.msra.mxu1 %v1960_v61  ;;  %v172_v53 = vlaneseq }
  0x89   :  { %1322 = vmatprep.subr.bf16.mxu1 %v1968_v43  ;;  %v868_v43 = vstv %s2275_s0 }
  0x8b   :  { %1282 = vmatpush1.bf16.msra.mxu0 %v1930_v54  ;;  %v2195_v54 = vshrl.u32 %v172_v53, 7  ;;  %v945_v53 = vld [vmem:[%s2281_s6] sm:$0x3] }
  0x8c   :  { %1283 = vmatprep.subr.bf16.mxu0 %v1935_v55  ;;  %1323 = vmatpush1.bf16.msra.mxu1 %v1966_v0 }
  0x8d   :  { %1324 = vmatprep.subr.bf16.mxu1 %v1974_v1  ;;  %v174_v55 = vsub.s32 0, %v2195_v54  ;;  %v178_v57 = vsub.s32 1, %v2195_v54 }
  0x8f   :  { %1284 = vmatpush1.bf16.msra.mxu0 %v1933_v58  ;;  %v175_v58 = vrot.slane %v170_v56, %v174_v55  ;;  %v179_v59 = vrot.slane %v170_v56, %v178_v57 }
  0x90   :  { %1285 = vmatprep.subr.bf16.mxu0 %v1938_v60  ;;  %1325 = vmatpush1.bf16.msra.mxu1 %v1972_v4 }
  0x91   :  { %1326 = vmatprep.subr.bf16.mxu1 %v1980_v9 }
  0x93   :  { %1286 = vmatpush1.bf16.msra.mxu0 %v1936_v62 }
  0x94   :  { %1287 = vmatprep.subr.bf16.mxu0 %v1941_v63  ;;  %1327 = vmatpush1.bf16.msra.mxu1 %v1978_v10  ;;  %v182_v10 = vsub.s32 2, %v2195_v54 }
  0x95   :  { %1328 = vmatprep.subr.bf16.mxu1 %v1986_v13 }
  0x97   :  { %1288 = vmatpush1.bf16.msra.mxu0 %v1939_v2 }
  0x98   :  { %1289 = vmatprep.subr.bf16.mxu0 %v1944_v3  ;;  %1329 = vmatpush1.bf16.msra.mxu1 %v1984_v14 }
  0x99   :  { %1330 = vmatprep.subr.bf16.mxu1 %v1992_v17 }
  0x9b   :  { %1290 = vmatpush1.bf16.msra.mxu0 %v1942_v5 }
  0x9c   :  { %1291 = vmatprep.subr.bf16.mxu0 %v1947_v6  ;;  %1331 = vmatpush1.bf16.msra.mxu1 %v1990_v18 }
  0x9d   :  { %1332 = vmatprep.subr.bf16.mxu1 %v1995_v21 }
  0x9f   :  { %1292 = vmatpush1.bf16.msra.mxu0 %v1945_v7 }
  0xa0   :  { %1293 = vmatprep.subr.bf16.mxu0 %v1950_v8  ;;  %1333 = vmatpush1.bf16.msra.mxu1 %v1993_v22 }
  0xa1   :  { %1334 = vmatprep.subr.bf16.mxu1 %v1998_v24 }
  0xa3   :  { %1294 = vmatpush2.bf16.msra.mxu0 %v1948_v11  ;;  %v186_v11 = vsub.s32 3, %v2195_v54 }
  0xa4   :  { %1295 = vmatprep.subr.bf16.mxu0 %v1953_v12  ;;  %1335 = vmatpush2.bf16.msra.mxu1 %v1996_v26  ;;  %v183_v12 = vrot.slane %v170_v56, %v182_v10 }
  0xa5   :  { %1336 = vmatprep.subr.bf16.mxu1 %v2001_v27  ;;  %v187_v13 = vrot.slane %v170_v56, %v186_v11  ;;  %v950_v56 = vrot.slane %v945_v53, %v174_v55 }
  0xa7   :  { %1296 = vmatpush2.bf16.msra.mxu0 %v1951_v15 }
  0xa8   :  { %1297 = vmatprep.subr.bf16.mxu0 %v1959_v16  ;;  %1337 = vmatpush2.bf16.msra.mxu1 %v1999_v31 }
  0xa9   :  { %1338 = vmatprep.subr.bf16.mxu1 %v2004_v29 }
  0xab   :  { %1298 = vmatpush2.bf16.msra.mxu0 %v1957_v19 }
  0xac   :  { %1299 = vmatprep.subr.bf16.mxu0 %v1965_v20  ;;  %1339 = vmatpush2.bf16.msra.mxu1 %v2002_v34  ;;  %v2022_v34 = vld [vmem:[%s2282_s7 + $0x70] sm:$0xff]  }
  0xad   :  { %1340 = vmatprep.subr.bf16.mxu1 %v2007_v35  ;;  %v2023_v35 = vld [vmem:[%s2282_s7 + $0x30] sm:$0xff]  }
  0xaf   :  { %1300 = vmatpush2.bf16.msra.mxu0 %v1963_v23 }
  0xb0   :  { %1301 = vmatprep.subr.bf16.mxu0 %v1971_v25  ;;  %1341 = vmatpush2.bf16.msra.mxu1 %v2005_v38  ;;  %v2026_v38 = vld [vmem:[%s2282_s7 + $0x60] sm:$0xff]  }
  0xb1   :  { %1342 = vmatprep.subr.bf16.mxu1 %v2010_v39  ;;  %v2027_v39 = vld [vmem:[%s2282_s7 + $0x20] sm:$0xff]  }
  0xb3   :  { %1302 = vmatpush2.bf16.msra.mxu0 %v1969_v28 }
  0xb4   :  { %1303 = vmatprep.subr.bf16.mxu0 %v1977_v30  ;;  %1343 = vmatpush2.bf16.msra.mxu1 %v2008_v41  ;;  %v2029_v41 = vld [vmem:[%s2282_s7 + $0x18] sm:$0xff]  }
  0xb5   :  { %1344 = vmatprep.subr.bf16.mxu1 %v2013_v42  ;;  %v2030_v42 = vld [vmem:[%s2282_s7 + $0x50] sm:$0xff]  }
  0xb7   :  { %1304 = vmatpush2.bf16.msra.mxu0 %v1975_v32  ;;  %v2020_v32 = vld [vmem:[%s2282_s7 + $0x78] sm:$0xff]  }
  0xb8   :  { %1305 = vmatprep.subr.bf16.mxu0 %v1983_v33  ;;  %1345 = vmatpush2.bf16.msra.mxu1 %v2011_v44  ;;  %v2021_v33 = vld [vmem:[%s2282_s7 + $0x38] sm:$0xff]   ;;  %v2031_v44 = vld [vmem:[%s2282_s7 + $0x10] sm:$0xff]  }
  0xb9   :  { %1346 = vmatprep.subr.bf16.mxu1 %v2016_v45  ;;  %v2032_v45 = vld [vmem:[%s2282_s7 + $0x48] sm:$0xff]  }
  0xbb   :  { %1306 = vmatpush2.bf16.msra.mxu0 %v1981_v36  ;;  %v2024_v36 = vld [vmem:[%s2282_s7 + $0x68] sm:$0xff]  }
  0xbc   :  { %1307 = vmatprep.subr.bf16.mxu0 %v1989_v37  ;;  %1347 = vmatpush2.bf16.msra.mxu1 %v2014_v46  ;;  %v2025_v37 = vld [vmem:[%s2282_s7 + $0x28] sm:$0xff]  }
  0xbd   :  { %1348 = vmatprep.subr.bf16.mxu1 %v2019_v47  ;;  %v2033_v46 = vld [vmem:[%s2282_s7 + $0x8] sm:$0xff]   ;;  %v2034_v47 = vld [vmem:[%s2282_s7 + $0x40] sm:$0xff]  }
  0xbf   :  { %1308 = vmatpush2.bf16.msra.mxu0 %v1987_v40  ;;  %v2028_v40 = vld [vmem:[%s2282_s7 + $0x58] sm:$0xff]  }
  0xc0   :  { %1349 = vmatpush2.bf16.msra.mxu1 %v2017_v48  ;;  %1747 = vmatprep.subr.bf16.mxu0 %v2020_v32  ;;  %v2035_v48 = vld [vmem:[%s2282_s7] sm:$0xff]  }
 0x103   :  { %v774_v49 = vpop.f32.mrf.mxu1 }
 0x105   :  { %v776_v50 = vpop.f32.mrf.mxu1 }
 0x107   :  { %v778_v51 = vpop.f32.mrf.mxu1 }
 0x109   :  { %v779_v52 = vpop.f32.mrf.mxu1 }
 0x11e   :  { %v733_v60 = vpop.f32.mrf.mxu0 }
 0x11f   :  { %v734_v61 = vadd.f32 %v733_v60, %v175_v58  ;;  %v954_v58 = vrot.slane %v945_v53, %v178_v57 }
 0x120   :  { %v735_v62 = vpop.f32.mrf.mxu0 }
 0x121   :  { %v775_v63 = vadd.f32 %v774_v49, %v734_v61  ;;  %v736_v0 = vadd.f32 %v735_v62, %v179_v59  ;;  %v1362_v61 = vstv %s2276_s1  ;;  %s2108_s1 = smov [#allocation9]  }
 0x122   :  { %v737_v1 = vpop.f32.mrf.mxu0  ;;  %s1552_s19 = sshll.u32 %s2108_s1, 4  ;;  %s1553_s19 = int_to_ptr.vmem [resolvable:$true] %s1552_s19 }
 0x123   :  { %vm863_vm2 = vcmp.ge.f32.partialorder %v775_v63, 0.0  ;;  %v869_v2 = vmul.f32 %v868_v43, %v775_v63  ;;  %v777_v3 = vadd.f32 %v776_v50, %v736_v0  ;;  %s2076_s20 = scalar_lea.vmem %s1553_s19, 128  ;;  %p2081_p11 = scmp.lt.s32.totalorder %s1553_s19, %s1553_s19 }
 0x124   :  { %v738_v4 = vpop.f32.mrf.mxu0  ;;  %p2077_p10 = scmp.ne.s32.totalorder %s1553_s19, %s2076_s20  ;;  %p2082_p12 = scmp.lt.s32.totalorder %s2076_s20, %s2076_s20 }
 0x125   :  { %v870_v5 = vmul.f32 %v868_v43, %v777_v3  ;;  %vm864_vm3 = vcmp.ge.f32.partialorder %v777_v3, 0.0  ;;  %v873_v6 = vsel %vm863_vm2, %v775_v63, %v869_v2 }
 0x126   :  { %v877_v9 = vpack.c.bf16 %v873_v6, %v873_v6  ;;  %p2083_p13 = por %p2082_p12, %p2081_p11 }
 0x127   :  { %v874_v7 = vsel %vm864_vm3, %v777_v3, %v870_v5 }
 0x128   :  { %v878_v8 = vpack.c.bf16 %v874_v7, %v874_v7  ;;  %v1730_v7 = vld [vmem:[%s2283_s8] ss:$0 sm:$0xff]  ;;  %p2084_p0 = pnand %p2083_p13, %p2077_p10 }
 0x12a   :  { %1309 = vmatprep.mubr.bf16.mxu0 %v878_v8 }
 0x12b   :  { %1310 = vmatmul.mubr.bf16.vlgmr.msra.gmra.mxu0 %v877_v9 }
 0x12c   :  { %1748 = vmatpush3.bf16.msra.mxu0 %v2021_v33 }
 0x12d   :  { %1749 = vmatprep.subr.bf16.mxu0 %v2022_v34 }
 0x130   :  { %1750 = vmatpush3.bf16.msra.mxu0 %v2023_v35 }
 0x131   :  { %1751 = vmatprep.subr.bf16.mxu0 %v2024_v36 }
 0x134   :  { %1752 = vmatpush3.bf16.msra.mxu0 %v2025_v37 }
 0x135   :  { %1753 = vmatprep.subr.bf16.mxu0 %v2026_v38 }
 0x138   :  { %1754 = vmatpush3.bf16.msra.mxu0 %v2027_v39 }
 0x139   :  { %1755 = vmatprep.subr.bf16.mxu0 %v2028_v40 }
 0x13c   :  { %1756 = vmatpush3.bf16.msra.mxu0 %v2029_v41 }
 0x13d   :  { %1757 = vmatprep.subr.bf16.mxu0 %v2030_v42 }
 0x140   :  { %1758 = vmatpush3.bf16.msra.mxu0 %v2031_v44 }
 0x141   :  { %1759 = vmatprep.subr.bf16.mxu0 %v2032_v45 }
 0x142   :  { %v856_v15 = vpop.f32.mrf.mxu0 }
 0x143   :  { %v815_v14 = vpop.f32.mrf.mxu1 }
 0x144   :  { %v816_v16 = vadd.f32 %v815_v14, %v183_v12  ;;  %v858_v18 = vpop.f32.mrf.mxu0  ;;  %1760 = vmatpush3.bf16.msra.mxu0 %v2033_v46 }
 0x145   :  { %v817_v17 = vpop.f32.mrf.mxu1  ;;  %1761 = vmatprep.subr.bf16.mxu0 %v2034_v47 }
 0x146   :  { %v857_v19 = vadd.f32 %v856_v15, %v816_v16  ;;  %v818_v20 = vadd.f32 %v817_v17, %v187_v13  ;;  %v860_v22 = vpop.f32.mrf.mxu0 }
 0x147   :  { %v819_v21 = vpop.f32.mrf.mxu1 }
 0x148   :  { %vm865_vm4 = vcmp.ge.f32.partialorder %v857_v19, 0.0  ;;  %v871_v23 = vmul.f32 %v868_v43, %v857_v19  ;;  %v859_v24 = vadd.f32 %v858_v18, %v818_v20  ;;  %v861_v26 = vpop.f32.mrf.mxu0  ;;  %1762 = vmatpush3.bf16.msra.mxu0 %v2035_v48 }
 0x149   :  { %v820_v25 = vpop.f32.mrf.mxu1 }
 0x14a   :  { %vm866_vm5 = vcmp.ge.f32.partialorder %v859_v24, 0.0  ;;  %v872_v27 = vmul.f32 %v868_v43, %v859_v24  ;;  %v875_v28 = vsel %vm865_vm4, %v857_v19, %v871_v23 }
 0x14b   :  { %v879_v29 = vpack.c.bf16 %v875_v28, %v875_v28 }
 0x14c   :  { %v876_v30 = vsel %vm866_vm5, %v859_v24, %v872_v27 }
 0x14d   :  { %v880_v31 = vpack.c.bf16 %v876_v30, %v876_v30 }
 0x14f   :  { %1350 = vmatprep.mubr.bf16.mxu1 %v880_v31 }
 0x150   :  { %1351 = vmatmul.mubr.bf16.vlgmr.msra.gmra.mxu1 %v879_v29 }
 0x1eb   :  { %v1311_v49 = vpop.f32.mrf.mxu0 }
 0x1ec   :  { %v1312_v59 = vadd.f32 %v1311_v49, %v950_v56 }
 0x1ed   :  { %v1313_v50 = vpop.f32.mrf.mxu0 }
 0x1ee   :  { %v1314_v43 = vadd.f32 %v1313_v50, %v954_v58 }
 0x1ef   :  { %v1315_v51 = vpop.f32.mrf.mxu0 }
 0x1f1   :  { %v1316_v52 = vpop.f32.mrf.mxu0 }
 0x210   :  { %v1352_v60 = vpop.f32.mrf.mxu1 }
 0x211   :  { %v1353_v62 = vadd.f32 %v1352_v60, %v1312_v59 }
 0x212   :  { %v1354_v63 = vpop.f32.mrf.mxu1 }
 0x213   :  { %vm1359_vm6 = vcmp.ge.f32.partialorder %v1353_v62, 0.0  ;;  %v1363_v0 = vmul.f32 %v1362_v61, %v1353_v62  ;;  %v1355_v1 = vadd.f32 %v1354_v63, %v1314_v43 }
 0x214   :  { %v1356_v2 = vpop.f32.mrf.mxu1 }
 0x215   :  { %vm1360_vm7 = vcmp.ge.f32.partialorder %v1355_v1, 0.0  ;;  %v1364_v3 = vmul.f32 %v1362_v61, %v1355_v1  ;;  %v1365_v4 = vsel %vm1359_vm6, %v1353_v62, %v1363_v0 }
 0x216   :  { %v1357_v55 = vpop.f32.mrf.mxu1  ;;  %v1367_v57 = vpack.c.bf16 %v1365_v4, %v1365_v4 }
 0x217   :  { %v1366_v5 = vsel %vm1360_vm7, %v1355_v1, %v1364_v3 }
 0x218   :  { %v1368_v54 = vpack.c.bf16 %v1366_v5, %v1366_v5 }
 0x21a   :  { %1536 = vmatprep.mubr.bf16.mxu0 %v1368_v54 }
 0x21b   :  { %1537 = vmatmul.mubr.bf16.vlgmr.msra.gmra.mxu0 %v1367_v57 }
 0x2db   :  { %v1763_v6 = vpop.f32.mrf.mxu0 }
 0x2dd   :  { %v1764_v8 = vpop.f32.mrf.mxu0 }
 0x2de   :  { %v1765_v9 = vadd.f32 %v1764_v8, %v1763_v6 }
 0x2df   :  { %v1766_v10 = vpop.f32.mrf.mxu0 }
 0x2e0   :  { %v1539_v11 = vadd.f32 %v1765_v9, %v1730_v7 }
 0x2e1   :  { %v1767_v12 = vpop.f32.mrf.mxu0 }
 0x2e2   :  { %1545 = vst.msk [vmem:[#allocation9] sm:$0xff] %vm1544_vm8, %v1539_v11 }
 0x2e3   :  { %2087 = shalt.err (!%p2084_p0)
}
 0x2e4   :  { %1555 = dma.vmem_to_hbm [thread:$0]  %s1553_s19, 128, %s2284_s9, [#allocation6]  }
 0x2e5   :  { %2100 = dma.done.wait [#allocation6], 128  }
 0x2e6   :  { %2101 = vsyncadd [#allocation6], 4294967168 }
 0x2e7   :  { %1559 = vsyncpa [#allocation5], 1 }
 0x2e8   :  { %1560 = vsyncpa [#allocation8], 1 }
 0x2e9   :  { %1561 = vsyncpa [#allocation6], 1 }

</bundles_post_ra>
